<compile_context>
chip_gen: v5e
topology: v5e:2x2
jax: 0.10.0
libtpu: 0.0.40
codegen_flags: <defaults>
</compile_context>

<pallas_src>
import jax
import jax.numpy as jnp
from jax.experimental import pallas as pl
from jax.experimental.pallas import tpu as pltpu


def _round_up(x, m):
    return (x + m - 1) // m * m


# ----------------------------- Pallas kernel ------------------------------- #
def _linear_kernel(x_ref, w_ref, b_ref, o_ref):
    # x_ref: (TM, K)  w_ref: (K, TE)  b_ref: (1, TE)  o_ref: (TM, TE)
    acc = jnp.dot(x_ref[...], w_ref[...], preferred_element_type=jnp.float32)
    o_ref[...] = (acc + b_ref[...]).astype(o_ref.dtype)


def _linear_pallas(x2d, w, b, *, out_dtype, max_tile_m=512, min_m_steps=4,
                   resident_weight_budget=40 << 20):
    """(M, K) @ (K, E_pad) + b -> (M_pad trimmed to M, E_pad) in out_dtype.

    `w` (K, E_pad) and `b` (1, E_pad) must already be lane-padded to a multiple
    of 128 and in their kernel dtypes (done once at module init).
    """
    M, K = x2d.shape
    Kw, E_pad = w.shape
    assert Kw == K and E_pad % 128 == 0
    assert b.shape == (1, E_pad)

    row_align = 16 if x2d.dtype == jnp.bfloat16 else 8

    # ---- tile_m: big (amortize per-step overhead) but keep >=4 grid steps --- #
    tile_m = max(row_align, min(max_tile_m, _round_up(M, row_align)))
    tile_m = _round_up(tile_m, row_align)
    while (tile_m // 2 >= row_align
           and _round_up(M, tile_m) // tile_m < min_m_steps):
        tile_m //= 2
    tile_m = max(row_align, _round_up(tile_m, row_align))
    M_pad = _round_up(M, tile_m)
    if M_pad != M:
        # bf16 pad; fused into the kernel input under jit (allow_input_fusion).
        x2d = jnp.pad(x2d, ((0, M_pad - M), (0, 0)))
    grid_m = M_pad // tile_m

    out_itemsize = jnp.dtype(out_dtype).itemsize
    x_itemsize = jnp.dtype(x2d.dtype).itemsize
    w_itemsize = jnp.dtype(w.dtype).itemsize
    b_itemsize = jnp.dtype(b.dtype).itemsize

    cost = pl.CostEstimate(
        flops=2 * M_pad * K * E_pad,
        transcendentals=0,
        bytes_accessed=(M_pad * K * x_itemsize + K * E_pad * w_itemsize
                        + E_pad * b_itemsize + M_pad * E_pad * out_itemsize),
    )

    # VMEM estimate for the resident-weight (1-D grid) layout, double buffers.
    resident_vmem = 2 * (tile_m * K * x_itemsize
                         + K * E_pad * w_itemsize
                         + E_pad * b_itemsize
                         + tile_m * E_pad * out_itemsize)

    if resident_vmem <= resident_weight_budget:
        # 1-D grid over M tiles; full (K, E_pad) weight + bias stay resident in
        # VMEM (constant index_map -> DMA'd once, never re-streamed per M tile).
        grid = (grid_m,)
        in_specs = [
            pl.BlockSpec((tile_m, K), lambda i: (i, 0)),
            pl.BlockSpec((K, E_pad), lambda i: (0, 0)),
            pl.BlockSpec((1, E_pad), lambda i: (0, 0)),
        ]
        out_specs = pl.BlockSpec((tile_m, E_pad), lambda i: (i, 0))
        dim_sem = ("parallel",)
        vmem_needed = resident_vmem
    else:
        # Fallback for very large E (v7x has only 64 MiB VMEM): tile E too.
        tile_e = 128
        for cand in (1024, 512, 256, 128):
            if E_pad % cand == 0:
                tile_e = cand
                break
        grid = (grid_m, E_pad // tile_e)
        in_specs = [
            # x block constant over the inner E axis -> reused, not re-DMA'd.
            pl.BlockSpec((tile_m, K), lambda i, j: (i, 0)),
            # Weight is streamed per (i, j); triple-buffer to hide the DMA.
            pl.BlockSpec((K, tile_e), lambda i, j: (0, j),
                         pipeline_mode=pl.Buffered(3)),
            pl.BlockSpec((1, tile_e), lambda i, j: (0, j)),
        ]
        out_specs = pl.BlockSpec((tile_m, tile_e), lambda i, j: (i, j))
        dim_sem = ("parallel", "parallel")
        vmem_needed = (2 * (tile_m * K * x_itemsize
                            + tile_e * b_itemsize
                            + tile_m * tile_e * out_itemsize)
                       + 3 * K * tile_e * w_itemsize)

    # Explicit scoped-VMEM limit: enough headroom, capped at v7x physical 64 MiB.
    vmem_limit = int(min(64 << 20, max(32 << 20, int(vmem_needed * 1.5))))

    out = pl.pallas_call(
        _linear_kernel,
        out_shape=jax.ShapeDtypeStruct((M_pad, E_pad), out_dtype),
        grid_spec=pltpu.PrefetchScalarGridSpec(
            num_scalar_prefetch=0,
            grid=grid,
            in_specs=in_specs,
            out_specs=out_specs,
        ),
        compiler_params=pltpu.CompilerParams(
            dimension_semantics=dim_sem,
            vmem_limit_bytes=vmem_limit,
            # Let XLA fuse the patchify transpose / bf16 cast / row padding
            # directly into the activation operand (no HBM materialization).
            allow_input_fusion=[True, False, False],
        ),
        cost_estimate=cost,
    )(x2d, w, b)

    if M_pad != M:
        out = out[:M]
    return out


# ------------------------------ Module wrapper ------------------------------ #
class Input2dToEmbeddings:
    """JAX/Pallas port of the PyTorch Input2dToEmbeddings module."""

    def __init__(self, input_size, patch_size, in_channels, embed_dim, key,
                 compute_dtype=jnp.bfloat16, out_dtype=None):
        if isinstance(input_size, int):
            input_size = [input_size] * 2
        if isinstance(patch_size, int):
            patch_size = [patch_size] * 2
        assert len(input_size) == 2 and len(patch_size) == 2
        for i, p in zip(input_size, patch_size):
            assert i % p == 0
        self.input_size = list(input_size)
        self.patch_size = list(patch_size)
        self.in_channels = in_channels
        self.embed_dim = embed_dim
        self.compute_dtype = compute_dtype
        # bf16 output by default (downstream transformer blocks are bf16);
        # pass out_dtype=jnp.float32 to match PyTorch's f32 Linear output.
        self.out_dtype = compute_dtype if out_dtype is None else out_dtype

        p1, p2 = self.patch_size
        in_features = in_channels * p1 * p2

        # Deterministic init mimicking nn.Linear (uniform in +-1/sqrt(fan_in)).
        # PyTorch-semantic weight kept as (K, E) with K rows in the einops
        # '(p1 p2 c)' order (c fastest) -- what an imported weight.T looks like.
        k_w, k_b = jax.random.split(key)
        bound = 1.0 / float(in_features) ** 0.5
        self.weight = jax.random.uniform(
            k_w, (in_features, embed_dim), jnp.float32, -bound, bound)
        self.bias = jax.random.uniform(
            k_b, (1, embed_dim), jnp.float32, -bound, bound)

        # Kernel-side weight, built ONCE here (not per call):
        #   * K rows permuted '(p1 p2 c)' -> '(c p1 p2)' so the activation
        #     patchify keeps the fastest spatial axis contiguous,
        #   * E lane-padded to a multiple of 128 (unmasked stores),
        #   * cast to the MXU-native compute dtype (bf16); bias kept f32 and
        #     added on the f32 accumulator.
        self.e_pad = _round_up(embed_dim, 128)
        w4 = self.weight.reshape(p1, p2, in_channels, embed_dim)
        w_cpp = jnp.transpose(w4, (2, 0, 1, 3)).reshape(in_features, embed_dim)
        self._w_kernel = jnp.pad(
            w_cpp, ((0, 0), (0, self.e_pad - embed_dim))).astype(compute_dtype)
        self._b_kernel = jnp.pad(
            self.bias, ((0, 0), (0, self.e_pad - embed_dim))).astype(jnp.float32)

    @property
    def length(self):
        return (self.input_size[0] // self.patch_size[0]) * (
            self.input_size[1] // self.patch_size[1])

    # Reference patchify matching einops 'b c (h p1) (w p2) -> b (h w) (p1 p2 c)'.
    def _patchify_ref(self, x):
        B, C, H, W = x.shape
        p1, p2 = self.patch_size
        h, w = H // p1, W // p2
        x = x.reshape(B, C, h, p1, w, p2)
        x = jnp.transpose(x, (0, 2, 4, 3, 5, 1))      # (B, h, w, p1, p2, C)
        return x.reshape(B, h * w, p1 * p2 * C)

    def __call__(self, input_2d):
        assert input_2d.ndim == 4
        assert input_2d.shape[1] == self.in_channels
        assert all(a == b for a, b in zip(input_2d.shape[2:], self.input_size))
        B, C, H, W = input_2d.shape
        p1, p2 = self.patch_size
        h, w = H // p1, W // p2

        # Cast to the compute dtype FIRST (halves the transpose bandwidth),
        # then patchify with K ordered '(c p1 p2)' so the innermost axis (p2)
        # stays contiguous. Under jit this producer chain fuses into the Pallas
        # activation input via allow_input_fusion (no HBM materialization).
        x = input_2d.astype(self.compute_dtype)
        x = x.reshape(B, C, h, p1, w, p2)
        x = jnp.transpose(x, (0, 2, 4, 1, 3, 5))      # (B, h, w, C, p1, p2)
        flat = x.reshape(B * h * w, C * p1 * p2)      # (M, K), K = '(c p1 p2)'

        out = _linear_pallas(flat, self._w_kernel, self._b_kernel,
                             out_dtype=self.out_dtype)  # (M, E_pad)
        out = out[:, :self.embed_dim]
        return out.reshape(B, h * w, self.embed_dim)


# ----------------------------------- Main ----------------------------------- #
if __name__ == "__main__":
    key = jax.random.PRNGKey(0)
    k_x, k_p = jax.random.split(key)

    B, C, H, W = 2, 4, 16, 16
    patch = 4
    embed_dim = 32

    x = jax.random.normal(k_x, (B, C, H, W), jnp.float32)

    module = Input2dToEmbeddings(
        input_size=[H, W], patch_size=patch, in_channels=C,
        embed_dim=embed_dim, key=k_p)

    fwd = jax.jit(module.__call__)   # jit so patchify/cast fuses into the kernel
    out = jax.block_until_ready(fwd(x))

    # Pure-JAX f32 reference with the original einops ordering and weight.
    ref_patches = module._patchify_ref(x)
    ref = ref_patches @ module.weight + module.bias[0]

    assert out.shape == (B, module.length, embed_dim)
    assert out.dtype == module.out_dtype
    out_f32 = out.astype(jnp.float32)
    # bf16 MXU inputs + bf16 output with f32 accumulation -> loosened tolerance.
    assert jnp.allclose(out_f32, ref, atol=3e-2, rtol=3e-2), (
        float(jnp.max(jnp.abs(out_f32 - ref))))

    print("KERNEL_OK")
</pallas_src>

<mosaic_0001>
module attributes {stable_mosaic.version = 11 : i64} {
  func.func @_linear_kernel(%arg0: i32, %arg1: memref<16x64xbf16, #tpu.memory_space<vmem>>, %arg2: memref<64x128xbf16, #tpu.memory_space<vmem>>, %arg3: memref<1x128xf32, #tpu.memory_space<vmem>>, %arg4: memref<16x128xbf16, #tpu.memory_space<vmem>>) attributes {dimension_semantics = [#tpu.dimension_semantics<parallel>], iteration_bounds = array<i64: 2>, scalar_prefetch = 0 : i64, scratch_operands = 0 : i64, tpu.core_type = #tpu.core_type<tc>, window_params = [{transform_indices = @transform_0, window_bounds = array<i64: 16, 64>}, {pipeline_mode = #tpu.pipeline_mode<synchronous>, transform_indices = @transform_1, window_bounds = array<i64: 64, 128>}, {pipeline_mode = #tpu.pipeline_mode<synchronous>, transform_indices = @transform_2, window_bounds = array<i64: 1, 128>}, {transform_indices = @transform_3, window_bounds = array<i64: 16, 128>}]} {
    %c0 = arith.constant 0 : index
    %c0_0 = arith.constant 0 : index
    %0 = vector.load %arg1[%c0, %c0_0] : memref<16x64xbf16, #tpu.memory_space<vmem>>, vector<16x64xbf16>
    %c0_1 = arith.constant 0 : index
    %c0_2 = arith.constant 0 : index
    %1 = vector.load %arg2[%c0_1, %c0_2] : memref<64x128xbf16, #tpu.memory_space<vmem>>, vector<64x128xbf16>
    %cst = arith.constant dense<0.000000e+00> : vector<16x128xf32>
    %2 = tpu.matmul %0, %1, %cst {dimension_numbers = #tpu.dot_dimension_numbers<[1], [0], [0], [1], [0, 0, 1, 1], [], []>} : vector<16x64xbf16>, vector<64x128xbf16>, vector<16x128xf32> -> vector<16x128xf32>
    %c0_3 = arith.constant 0 : index
    %c0_4 = arith.constant 0 : index
    %3 = vector.load %arg3[%c0_3, %c0_4] : memref<1x128xf32, #tpu.memory_space<vmem>>, vector<1x128xf32>
    %4 = vector.broadcast %3 : vector<1x128xf32> to vector<16x128xf32>
    %5 = arith.addf %2, %4 : vector<16x128xf32>
    %6 = arith.truncf %5 : vector<16x128xf32> to vector<16x128xbf16>
    %c0_5 = arith.constant 0 : index
    %c0_6 = arith.constant 0 : index
    %7 = vector.load %arg4[%c0_5, %c0_6] : memref<16x128xbf16, #tpu.memory_space<vmem>>, vector<16x128xbf16>
    tpu.vector_store %arg4[%c0_5, %c0_6], %6 {strides = array<i32>} : memref<16x128xbf16, #tpu.memory_space<vmem>>, vector<16x128xbf16>,
    return
  }
  func.func @transform_0(%arg0: i32) -> (i32, i32) {
    %c0_i32 = arith.constant 0 : i32
    %c0_i32_0 = arith.constant 0 : i32
    return %arg0, %c0_i32 : i32, i32
  }
  func.func @transform_1(%arg0: i32) -> (i32, i32) {
    %c0_i32 = arith.constant 0 : i32
    %c0_i32_0 = arith.constant 0 : i32
    %c0_i32_1 = arith.constant 0 : i32
    return %c0_i32, %c0_i32_0 : i32, i32
  }
  func.func @transform_2(%arg0: i32) -> (i32, i32) {
    %c0_i32 = arith.constant 0 : i32
    %c0_i32_0 = arith.constant 0 : i32
    %c0_i32_1 = arith.constant 0 : i32
    return %c0_i32, %c0_i32_0 : i32, i32
  }
  func.func @transform_3(%arg0: i32) -> (i32, i32) {
    %c0_i32 = arith.constant 0 : i32
    %c0_i32_0 = arith.constant 0 : i32
    return %arg0, %c0_i32 : i32, i32
  }
}

</mosaic_0001>

<bundles_post_ra>
// kernel: a_call__.1
= control target key start
LH: loop header
LB: loop body
LE: loop exit
PB: predicated region body
PF: predicated region fallthrough
CT: control target
= control target key end

     0   :  { %8 = vsyncpa [#allocation3], 0  ;;  %s590_s0 = inlined_call_operand.vmem [shape: bf16[32,64], index: 0, kind: input, shape index: {}]   ;;  %s591_s1 = inlined_call_operand.vmem [shape: bf16[64,128], index: 1, kind: input, shape index: {}]   ;;  %s592_s2 = inlined_call_operand.vmem [shape: f32[1,128], index: 2, kind: input, shape index: {}]   ;;  %s593_s3 = inlined_call_operand.hbm [shape: bf16[32,128], index: 3, kind: output, shape index: {}]  }
   0x1   :  { %10 = vsyncpa [#allocation3 + $0x1], 0  ;;  %s488_s12 = smov 0   ;;  %s490_s13 = smov 0  }
   0x2   :  { %s492_s14 = smov 0   ;;  %s494_s15 = smov 0  }
   0x3 LB: > { %s509_s16 = sadd.s32 4294967295, %s464_s15   ;;  %s316_s17 = sadd.s32 4294967294, %s464_s15   ;;  %s464_s15 = sphi %s494_s15, %s599_s15   ;;  %s460_s14 = sphi %s492_s14, %s598_s14   ;;  %s456_s13 = sphi %s490_s13, %s597_s13   ;;  %s452_s12 = sphi %s488_s12, %s596_s12  }
   0x4   : > { %s513_s18 = sadd.s32 1, %s464_s15   ;;  %s91_s19 = sadd.s32 1, %s460_s14 }
   0x5   : > { %s88_s20 = ssub.s32 %s464_s15, %s513_s18  ;;  %p101_p0 = scmp.ne.s32.totalorder %s460_s14, %s456_s13 }
   0x6   : > { %p89_p1 = scmp.eq.s32.totalorder %s88_s20, 0  ;;  %p102_p2 = scmp.eq.s32.totalorder %s509_s16, 1 }
   0x7   : > { %p107_p3 = scmp.ne.s32.totalorder %s456_s13, %s452_s12  ;;  %p108_p4 = scmp.eq.s32.totalorder %s316_s17, 1 }
   0x8   : > { %s524_s21 = scalar_select %p89_p1, %s460_s14, %s91_s19  }
   0x9   : > { %p526_p5 = por %p102_p2, %p101_p0  ;;  %p530_p6 = por %p108_p4, %p107_p3 }
   0xa   : > { %p319_p7 = scmp.ge.s32.totalorder %s464_s15, 1  ;;  %p141_p8 = scmp.lt.s32.totalorder %s464_s15, 3 }
   0xc   : > { %p142_p9 = pnand %p319_p7, %p141_p8 }
   0xd   : > { %s321_s26 = sshll.u32 (!%p142_p9), %s509_s16, 1  ;;  %s162_s10 = sand.u32 (!%p142_p9), 1, %s456_s13  }
   0xe   : > { %145 = sbr.rel (%p142_p9) target bundleno = 177 (0xb1), region = 32  ;;  %p166_p10 = scmp.lt.s32.totalorder (!%p142_p9), %s321_s26, 3 }
   0xf   : > { %s320_s11 = sshll.u32 (!%p142_p9), %s162_s10, 3  ;;  %s354_s17 = sshll.u32 (!%p142_p9), %s509_s16, 3 }
  0x10   : > { %s250_s24 = scalar_lea.hbm (!%p142_p9), %s593_s3, %s354_s17  ;;  %s164_s27 = scalar_lea.vmem (!%p142_p9), [#allocation2], %s320_s11 }
  0x11   : > { %s560_s28 = sshll.u32 (!%p142_p9), %s164_s27, 4  ;;  %s253_s29 = sshll.u32 (!%p142_p9), %s250_s24, 4  ;;  %s252_s28 = int_to_ptr.vmem [resolvable:$true] %s560_s28  ;;  %s254_s29 = int_to_ptr.hbm [resolvable:$true] %s253_s29 }
  0x12   : > { %s239_s16 = scalar_lea.sflag (!%p142_p9), [#allocation3], %s162_s10  ;;  %s416_s30 = sshra.s32 (!%p142_p9), %s254_s29, 4  ;;  %s417_s30 = int_to_ptr.hbm [resolvable:$true] %s416_s30 }
  0x13   : > { %v353_v0 = vld [vmem:[%s591_s1 + $0x18] sm:$0xff]  ;;  %v352_v1 = vld [vmem:[%s591_s1 + $0x10] sm:$0xff]  ;;  %s601_s26 = smov (!%p166_p10, %s321_s26), 3  ;;  %v351_v2 = vld [vmem:[%s591_s1 + $0x8] sm:$0xff]  ;;  %vm216_vm0 = vcmask 523264   ;;  %s422_s7 = scalar_lea.hbm %s593_s3, 16 }
  0x14   : > { %224 = vmatpush.bf16.msra.mxu0 %v353_v0  ;;  %s322_s4 = sshll.u32 %s601_s26, 2  ;;  %v350_v3 = vld [vmem:[%s591_s1] sm:$0xff]  ;;  %p423_p0 = scmp.lt.s32.totalorder %s417_s30, %s593_s3 }
  0x15   : > { %s169_s9 = scalar_lea.vmem %s590_s0, %s322_s4  ;;  %v401_v6 = vld [vmem:[%s592_s2] ss:$0 sm:$0xff]  ;;  %s418_s4 = scalar_lea.hbm %s417_s30, 8 }
  0x16   : > { %v349_v4 = vld [vmem:[%s169_s9] sm:$0xff]  ;;  %p419_p11 = scmp.ne.s32.totalorder %s417_s30, %s418_s4  ;;  %p424_p1 = scmp.lt.s32.totalorder %s422_s7, %s418_s4 }
  0x18   : > { %225 = vmatpush.bf16.msra.mxu0 %v352_v1  ;;  %p420_p12 = pnand %p419_p11, %p526_p5  ;;  %p425_p2 = por %p424_p1, %p423_p0 }
  0x1a   : > { %p421_p13 = pneg %p420_p12 }
  0x1c   : > { %226 = vmatpush.bf16.msra.mxu0 %v351_v2  ;;  %p426_p3 = pnand %p425_p2, %p421_p13 }
  0x20   : > { %227 = vmatpush.bf16.msra.mxu0 %v350_v3 }
  0x23   : > { %343 = vmatmul.msk.bf16.vlgmr.msra.gmra.mxu0 %vm216_vm0, %v349_v4 }
  0xa0   : > { %v229_v5 = vpop.f32.mrf.mxu0 }
  0xa1   : > { %v230_v8 = vadd.f32 %v401_v6, %v229_v5 }
  0xa8   : > { %v231_v7 = vpop.f32.mrf.mxu0 }
  0xa9   : > { %v232_v9 = vadd.f32 %v401_v6, %v231_v7 }
  0xab   : > { %v358_v10 = vpack.c.bf16 %v232_v9, %v230_v8 }
  0xad   : > { %359 = vst [vmem:[%s164_s27] sm:$0xff] %v358_v10  }
  0xae   : > { %429 = shalt.err (!%p426_p3)
}
  0xaf   : > { %s466_s10 = smov 64   ;;  %s467_s11 = smov 4  }
  0xb0   : > { %360 = dma.vmem_to_hbm [thread:$0]  (%p526_p5), %s252_s28, 128, %s254_s29, %s239_s16, %s466_s10, %s466_s10, %s467_s11  }
  0xb1 PF: > { %p366_p4 = scmp.ge.s32.totalorder %s464_s15, 2  ;;  %s268_s17 = sand.u32 1, %s452_s12  }
  0xb2   : > { %s269_s19 = scalar_lea.sflag [#allocation3], %s268_s17 }
  0xb3   : > { %p363_p7 = pnand %p366_p4, %p530_p6 }
  0xb5   : > { %p364_p8 = pneg %p363_p7 }
  0xb7   : > { %447 = dma.done.wait (%p364_p8), %s269_s19, 128  }
  0xb8   : > { %449 = vsyncadd (%p364_p8), %s269_s19, 4294967168  ;;  %p13_p9 = scmp.ge.s32.totalorder %s513_s18, 4   ;;  %s596_s12 = smov %s456_s13 }
  0xb9   : > { %s597_s13 = smov %s460_s14  ;;  %s598_s14 = smov %s524_s21 }
  0xba   : > { %s599_s15 = smov %s513_s18  ;;  %15 = sbr.rel (!%p13_p9) target bundleno = 3 (0x3), region = 67 }
  0xbf   :  { %275 = vsyncpa [#allocation3], 1 }
  0xc0   :  { %277 = vsyncpa [#allocation3 + $0x1], 1 }

</bundles_post_ra>
